<compile_context>
chip_gen: v6e
topology: v6e:2x2x1
jax: 0.10.0
libtpu: 0.0.40
codegen_flags: <defaults>
</compile_context>

<pallas_src>
import math

import jax
import jax.numpy as jnp
from jax import lax
from jax.experimental import pallas as pl
from jax.experimental.pallas import tpu as pltpu


def _gelu_exact(x):
    # PyTorch nn.GELU() default is the exact erf-based GELU.
    return 0.5 * x * (1.0 + lax.erf(x * (1.0 / math.sqrt(2.0))))


def conv3_gelu_kernel(x_ref, w_ref, b_ref, o_ref):
    # x_ref: (TM, 3*(W+2)*C)   im2col-along-H rows (lane-dense LHS slab)
    # w_ref: (3*(W+2)*C, W*C)  banded conv weights, all 3 ky taps folded along K
    # b_ref: (1, W*C)          lane-dense bias (f32)
    # o_ref: (TM, W*C)         lane-dense output tile
    acc = jnp.dot(x_ref[...], w_ref[...], preferred_element_type=jnp.float32)
    acc = acc + b_ref[...]                       # (1, W*C) broadcasts over the rows
    o_ref[...] = _gelu_exact(acc).astype(o_ref.dtype)


def _vmem_budget_bytes():
    """Physical VMEM minus 16 MiB headroom for Mosaic scratch / pipeline internals:
    ~48 MiB on v7x (64 MiB/TC), ~112 MiB on v5e/v6e (128 MiB)."""
    try:
        cap = int(pltpu.get_tpu_info().vmem_capacity_bytes)
    except Exception:
        cap = 64 * 1024 * 1024          # conservative default (v7x per-core size)
    return max(cap - 16 * 1024 * 1024, 16 * 1024 * 1024)


def _pick_m_tile(m_total, k, n, itemsize, vmem_budget):
    """M-axis tile: target 256 rows (fills the 256-wide MXU on v6e/v7x; two clean
    passes on v5e's 128-wide MXU), shrink if the tiles would not fit the VMEM
    budget, keep it a multiple of the 8-row sublane."""
    fixed = 2 * (k * n * itemsize) + 2 * (n * 4)          # weights + bias (worst case 2x)
    per_row = 2 * (k + n) * itemsize + n * 4              # dbl-buffered in/out + f32 acc
    tm = 256
    while tm > 8 and fixed + tm * per_row > vmem_budget:
        tm //= 2
    tm = max(8, (tm // 8) * 8)
    if m_total <= tm:
        return max(8, ((m_total + 7) // 8) * 8)           # one tile covers everything
    return tm


def _invariant_spec(block_shape, single_buffer):
    """BlockSpec for a grid-invariant operand; single-buffer it when supported so the
    (quadratic) banded weight is not held twice in VMEM (matters most on v7x)."""
    index_map = lambda i: (0,) * len(block_shape)
    if single_buffer and hasattr(pl, "Buffered"):
        try:
            return pl.BlockSpec(block_shape, index_map, pipeline_mode=pl.Buffered(1))
        except TypeError:
            pass
    return pl.BlockSpec(block_shape, index_map)


def _build_banded_weights(weight_oihw, W, dtype):
    """Fold all 9 conv taps into ONE (3*(W+2)*C, W*C) matrix.

    Row index = ky*(W+2)*C + wi*C + ci   (ky tap, padded input column wi, in-chan ci)
    Col index = w*C + co                 (output column w, out-chan co)
    Entry     = weight[co, ci, ky, wi-w] when 0 <= wi-w <= 2, else 0.
    # TODO(synk): width-tile this (Wt*C ~ 128/256 per tile, extra grid axis) before
    # using on large W*C -- the banded form inflates FLOPs/bytes by ~(W+2)/3 and the
    # matrix is O(W^2*C^2).
    """
    C = weight_oihw.shape[0]
    w_hwio = jnp.transpose(weight_oihw, (2, 3, 1, 0)).astype(jnp.float32)  # (ky,kx,Ci,Co)
    mats = []
    for ky in range(3):
        m = jnp.zeros(((W + 2) * C, W * C), jnp.float32)
        for kx in range(3):
            sel = jnp.eye(W + 2, W, k=-kx, dtype=jnp.float32)              # wi == w + kx
            m = m + jnp.einsum("pq,io->piqo", sel, w_hwio[ky, kx]).reshape(
                (W + 2) * C, W * C)
        mats.append(m)
    return jnp.concatenate(mats, axis=0).astype(dtype)                     # (3*(W+2)*C, W*C)


def conv3gn_forward(x_nchw, weight_oihw, bias, *, single_buffer_params=True):
    """GELU(Conv2d(x; k=3, s=1, p=1)).  The GroupNorm in __init__ is unused in forward()."""
    N, C, H, W = x_nchw.shape
    Wp2C = (W + 2) * C
    WC = W * C
    K = 3 * Wp2C
    dtype = x_nchw.dtype
    itemsize = jnp.dtype(dtype).itemsize

    # --- layout plumbing (fused by XLA inside the same jit) --------------------------
    x_nhwc = jnp.transpose(x_nchw, (0, 2, 3, 1))                    # (N,H,W,C)
    x_pad = jnp.pad(x_nhwc, ((0, 0), (1, 1), (1, 1), (0, 0)))       # (N,H+2,W+2,C)
    x_rows = x_pad.reshape(N, H + 2, Wp2C)                          # lane-dense rows
    # im2col along H only: the LHS row for output row h is [row h, row h+1, row h+2]
    # of the padded image, so the 3 ky taps become a single K = 3*(W+2)*C contraction.
    x_cat = jnp.concatenate(
        [x_rows[:, 0:H], x_rows[:, 1:H + 1], x_rows[:, 2:H + 2]], axis=-1
    ).reshape(N * H, K)                                             # (N*H, K)

    # TODO(synk): cast x_cat / w_banded to bfloat16 (keep f32 accumulation + epilogue)
    # for ~2-4x MXU throughput when exact 1e-5 PyTorch parity is not required.
    w_banded = _build_banded_weights(weight_oihw, W, dtype)         # (K, WC)
    b_lane = jnp.tile(bias.astype(jnp.float32), W).reshape(1, WC)   # (1, WC)

    # --- M tiling: batch folded into M, tile sized for the MXU and the VMEM budget ---
    m_total = N * H
    budget = _vmem_budget_bytes()
    tm = _pick_m_tile(m_total, K, WC, itemsize, budget)
    m_pad = ((m_total + tm - 1) // tm) * tm
    if m_pad != m_total:
        x_cat = jnp.pad(x_cat, ((0, m_pad - m_total), (0, 0)))
    grid = (m_pad // tm,)

    out_flat = pl.pallas_call(
        conv3_gelu_kernel,
        out_shape=jax.ShapeDtypeStruct((m_pad, WC), dtype),
        grid=grid,
        in_specs=[
            pl.BlockSpec((tm, K), lambda i: (i, 0)),
            _invariant_spec((K, WC), single_buffer_params),
            _invariant_spec((1, WC), single_buffer_params),
        ],
        out_specs=pl.BlockSpec((tm, WC), lambda i: (i, 0)),
        compiler_params=pltpu.CompilerParams(
            dimension_semantics=("parallel",),
            vmem_limit_bytes=budget,
        ),
    )(x_cat, w_banded, b_lane)

    out_nhwc = out_flat[:m_total].reshape(N, H, W, C)
    return jnp.transpose(out_nhwc, (0, 3, 1, 2))                    # back to NCHW


def reference_forward(x_nchw, weight_oihw, bias):
    y = lax.conv_general_dilated(
        x_nchw, weight_oihw,
        window_strides=(1, 1),
        padding=((1, 1), (1, 1)),
        dimension_numbers=("NCHW", "OIHW", "NCHW"),
    )
    y = y + bias.reshape(1, -1, 1, 1)
    return _gelu_exact(y)


if __name__ == "__main__":
    # channels=8 so the (unused-in-forward) GroupNorm(groups=8) is constructible.
    N, C, H, W = 2, 8, 16, 16

    key = jax.random.PRNGKey(0)
    kx, kw, kb = jax.random.split(key, 3)

    x = jax.random.normal(kx, (N, C, H, W), dtype=jnp.float32)

    # Deterministic Conv2d param init (Kaiming-uniform-like bounds).
    fan_in = C * 3 * 3
    bound = 1.0 / math.sqrt(fan_in)
    weight = jax.random.uniform(
        kw, (C, C, 3, 3), minval=-bound, maxval=bound, dtype=jnp.float32
    )
    bias = jax.random.uniform(
        kb, (C,), minval=-bound, maxval=bound, dtype=jnp.float32
    )

    fwd = jax.jit(conv3gn_forward, static_argnames=("single_buffer_params",))
    try:
        out = jax.block_until_ready(fwd(x, weight, bias, single_buffer_params=True))
    except Exception:
        # Fallback if this JAX/Mosaic build rejects single-buffered (Buffered(1)) specs.
        out = jax.block_until_ready(fwd(x, weight, bias, single_buffer_params=False))

    ref = jax.block_until_ready(reference_forward(x, weight, bias))

    assert out.shape == (N, C, H, W)
    max_err = float(jnp.max(jnp.abs(out - ref)))
    assert jnp.allclose(out, ref, atol=1e-5, rtol=1e-5), max_err

    print("KERNEL_OK")
</pallas_src>

<mosaic_0001>
module attributes {stable_mosaic.version = 11 : i64} {
  func.func @conv3_gelu_kernel(%arg0: i32, %arg1: memref<32x432xf32, #tpu.memory_space<vmem>>, %arg2: memref<432x128xf32, #tpu.memory_space<vmem>>, %arg3: memref<1x128xf32, #tpu.memory_space<vmem>>, %arg4: memref<32x128xf32, #tpu.memory_space<vmem>>) attributes {dimension_semantics = [#tpu.dimension_semantics<parallel>], iteration_bounds = array<i64: 1>, scalar_prefetch = 0 : i64, scratch_operands = 0 : i64, tpu.core_type = #tpu.core_type<tc>, window_params = [{transform_indices = @transform_0, window_bounds = array<i64: 32, 432>}, {pipeline_mode = #tpu.pipeline_mode<synchronous>, transform_indices = @transform_1, window_bounds = array<i64: 432, 128>}, {pipeline_mode = #tpu.pipeline_mode<synchronous>, transform_indices = @transform_2, window_bounds = array<i64: 1, 128>}, {transform_indices = @transform_3, window_bounds = array<i64: 32, 128>}]} {
    %c0 = arith.constant 0 : index
    %c0_0 = arith.constant 0 : index
    %0 = vector.load %arg1[%c0, %c0_0] : memref<32x432xf32, #tpu.memory_space<vmem>>, vector<32x432xf32>
    %c0_1 = arith.constant 0 : index
    %c0_2 = arith.constant 0 : index
    %1 = vector.load %arg2[%c0_1, %c0_2] : memref<432x128xf32, #tpu.memory_space<vmem>>, vector<432x128xf32>
    %cst = arith.constant dense<0.000000e+00> : vector<32x128xf32>
    %2 = tpu.matmul %0, %1, %cst {dimension_numbers = #tpu.dot_dimension_numbers<[1], [0], [0], [1], [0, 0, 1, 1], [], []>} : vector<32x432xf32>, vector<432x128xf32>, vector<32x128xf32> -> vector<32x128xf32>
    %c0_3 = arith.constant 0 : index
    %c0_4 = arith.constant 0 : index
    %3 = vector.load %arg3[%c0_3, %c0_4] : memref<1x128xf32, #tpu.memory_space<vmem>>, vector<1x128xf32>
    %4 = vector.broadcast %3 : vector<1x128xf32> to vector<32x128xf32>
    %5 = arith.addf %2, %4 : vector<32x128xf32>
    %cst_5 = arith.constant 5.000000e-01 : f32
    %6 = vector.broadcast %cst_5 : f32 to vector<32x128xf32>
    %7 = arith.mulf %6, %5 : vector<32x128xf32>
    %cst_6 = arith.constant 0.707106769 : f32
    %8 = vector.broadcast %cst_6 : f32 to vector<32x128xf32>
    %9 = arith.mulf %5, %8 : vector<32x128xf32>
    %10 = math.erf %9 : vector<32x128xf32>
    %cst_7 = arith.constant 1.000000e+00 : f32
    %11 = vector.broadcast %cst_7 : f32 to vector<32x128xf32>
    %12 = arith.addf %11, %10 : vector<32x128xf32>
    %13 = arith.mulf %7, %12 : vector<32x128xf32>
    %c0_8 = arith.constant 0 : index
    %c0_9 = arith.constant 0 : index
    %14 = vector.load %arg4[%c0_8, %c0_9] : memref<32x128xf32, #tpu.memory_space<vmem>>, vector<32x128xf32>
    tpu.vector_store %arg4[%c0_8, %c0_9], %13 {strides = array<i32>} : memref<32x128xf32, #tpu.memory_space<vmem>>, vector<32x128xf32>,
    return
  }
  func.func @transform_0(%arg0: i32) -> (i32, i32) {
    %c0_i32 = arith.constant 0 : i32
    %c0_i32_0 = arith.constant 0 : i32
    return %arg0, %c0_i32 : i32, i32
  }
  func.func @transform_1(%arg0: i32) -> (i32, i32) {
    %c0_i32 = arith.constant 0 : i32
    %c0_i32_0 = arith.constant 0 : i32
    %c0_i32_1 = arith.constant 0 : i32
    return %c0_i32, %c0_i32_0 : i32, i32
  }
  func.func @transform_2(%arg0: i32) -> (i32, i32) {
    %c0_i32 = arith.constant 0 : i32
    %c0_i32_0 = arith.constant 0 : i32
    %c0_i32_1 = arith.constant 0 : i32
    return %c0_i32, %c0_i32_0 : i32, i32
  }
  func.func @transform_3(%arg0: i32) -> (i32, i32) {
    %c0_i32 = arith.constant 0 : i32
    %c0_i32_0 = arith.constant 0 : i32
    return %arg0, %c0_i32 : i32, i32
  }
}

module attributes {stable_mosaic.version = 11 : i64} {
  func.func @conv3_gelu_kernel(%arg0: i32, %arg1: memref<32x432xf32, #tpu.memory_space<vmem>>, %arg2: memref<432x128xf32, #tpu.memory_space<vmem>>, %arg3: memref<1x128xf32, #tpu.memory_space<vmem>>, %arg4: memref<32x128xf32, #tpu.memory_space<vmem>>) attributes {dimension_semantics = [#tpu.dimension_semantics<parallel>], iteration_bounds = array<i64: 1>, scalar_prefetch = 0 : i64, scratch_operands = 0 : i64, tpu.core_type = #tpu.core_type<tc>, window_params = [{transform_indices = @transform_0, window_bounds = array<i64: 32, 432>}, {pipeline_mode = #tpu.pipeline_mode<synchronous>, transform_indices = @transform_1, window_bounds = array<i64: 432, 128>}, {pipeline_mode = #tpu.pipeline_mode<synchronous>, transform_indices = @transform_2, window_bounds = array<i64: 1, 128>}, {transform_indices = @transform_3, window_bounds = array<i64: 32, 128>}]} {
    %c0 = arith.constant 0 : index
    %c0_0 = arith.constant 0 : index
    %0 = vector.load %arg1[%c0, %c0_0] : memref<32x432xf32, #tpu.memory_space<vmem>>, vector<32x432xf32>
    %c0_1 = arith.constant 0 : index
    %c0_2 = arith.constant 0 : index
    %1 = vector.load %arg2[%c0_1, %c0_2] : memref<432x128xf32, #tpu.memory_space<vmem>>, vector<432x128xf32>
    %cst = arith.constant dense<0.000000e+00> : vector<32x128xf32>
    %2 = tpu.matmul %0, %1, %cst {dimension_numbers = #tpu.dot_dimension_numbers<[1], [0], [0], [1], [0, 0, 1, 1], [], []>} : vector<32x432xf32>, vector<432x128xf32>, vector<32x128xf32> -> vector<32x128xf32>
    %c0_3 = arith.constant 0 : index
    %c0_4 = arith.constant 0 : index
    %3 = vector.load %arg3[%c0_3, %c0_4] : memref<1x128xf32, #tpu.memory_space<vmem>>, vector<1x128xf32>
    %4 = vector.broadcast %3 : vector<1x128xf32> to vector<32x128xf32>
    %5 = arith.addf %2, %4 : vector<32x128xf32>
    %cst_5 = arith.constant 5.000000e-01 : f32
    %6 = vector.broadcast %cst_5 : f32 to vector<32x128xf32>
    %7 = arith.mulf %6, %5 : vector<32x128xf32>
    %cst_6 = arith.constant 0.707106769 : f32
    %8 = vector.broadcast %cst_6 : f32 to vector<32x128xf32>
    %9 = arith.mulf %5, %8 : vector<32x128xf32>
    %10 = math.erf %9 : vector<32x128xf32>
    %cst_7 = arith.constant 1.000000e+00 : f32
    %11 = vector.broadcast %cst_7 : f32 to vector<32x128xf32>
    %12 = arith.addf %11, %10 : vector<32x128xf32>
    %13 = arith.mulf %7, %12 : vector<32x128xf32>
    %c0_8 = arith.constant 0 : index
    %c0_9 = arith.constant 0 : index
    %14 = vector.load %arg4[%c0_8, %c0_9] : memref<32x128xf32, #tpu.memory_space<vmem>>, vector<32x128xf32>
    tpu.vector_store %arg4[%c0_8, %c0_9], %13 {strides = array<i32>} : memref<32x128xf32, #tpu.memory_space<vmem>>, vector<32x128xf32>,
    return
  }
  func.func @transform_0(%arg0: i32) -> (i32, i32) {
    %c0_i32 = arith.constant 0 : i32
    %c0_i32_0 = arith.constant 0 : i32
    return %arg0, %c0_i32 : i32, i32
  }
  func.func @transform_1(%arg0: i32) -> (i32, i32) {
    %c0_i32 = arith.constant 0 : i32
    %c0_i32_0 = arith.constant 0 : i32
    %c0_i32_1 = arith.constant 0 : i32
    return %c0_i32, %c0_i32_0 : i32, i32
  }
  func.func @transform_2(%arg0: i32) -> (i32, i32) {
    %c0_i32 = arith.constant 0 : i32
    %c0_i32_0 = arith.constant 0 : i32
    %c0_i32_1 = arith.constant 0 : i32
    return %c0_i32, %c0_i32_0 : i32, i32
  }
  func.func @transform_3(%arg0: i32) -> (i32, i32) {
    %c0_i32 = arith.constant 0 : i32
    %c0_i32_0 = arith.constant 0 : i32
    return %arg0, %c0_i32 : i32, i32
  }
}

</mosaic_0001>

<bundles_post_ra>
// kernel: tile.8
= control target key start
LH: loop header
LB: loop body
LE: loop exit
PB: predicated region body
PF: predicated region fallthrough
CT: control target
= control target key end

     0   :  { %s28_s0 = inlined_call_operand.vmem [shape: f32[8], index: 0, kind: input, shape index: {}]   ;;  %s29_s1 = inlined_call_operand.vmem [shape: f32[16,8], index: 1, kind: output, shape index: {}]  }
   0x1   :  { %v4_v0 = vld [vmem:[%s28_s0] ss:$0 sm:$0xff] }
   0x2   :  { %5 = vst [vmem:[%s29_s1] sm:$0xff] %v4_v0  ;;  %8 = vst [vmem:[%s29_s1 + $0x8] sm:$0xff] %v4_v0 }

// kernel: tile.9
= control target key start
LH: loop header
LB: loop body
LE: loop exit
PB: predicated region body
PF: predicated region fallthrough
CT: control target
= control target key end

     0   :  { %s133_s10 = smov 120   ;;  %s134_s11 = smov 104   ;;  %vm3_vm0 = vcmask 64512   ;;  %vm9_vm1 = vcmask 1048512   ;;  %vm15_vm2 = vcmask 982912   ;;  %vm21_vm3 = vcmask 917312   ;;  %s209_s0 = inlined_call_operand.vmem [shape: f32[16,8], index: 0, kind: input, shape index: {}]   ;;  %s210_s1 = inlined_call_operand.vmem [shape: f32[1,128], index: 1, kind: output, shape index: {}]  }
   0x1   :  { %v103_v0 = vld [vmem:[%s209_s0 + $0xf] sm:$0x1]   ;;  %v105_v1 = vld [vmem:[%s209_s0 + $0xd] sm:$0x1]   ;;  %v104_v2 = vld [vmem:[%s209_s0 + $0xe] sm:$0x1]  }
   0x2   :  { %7 = vrot.lane.b32.xlu0 %v103_v0, %s133_s10  ;;  %19 = vrot.lane.b32.xlu1 %v105_v1, %s134_s11  ;;  %v106_v3 = vld [vmem:[%s209_s0 + $0xc] sm:$0x1]   ;;  %s135_s16 = smov 112   ;;  %s136_s17 = smov 96   ;;  %v107_v4 = vld [vmem:[%s209_s0 + $0xb] sm:$0x1]  }
   0x3   :  { %v108_v5 = vld [vmem:[%s209_s0 + $0xa] sm:$0x1]   ;;  %v2_v6 = vld [vmem:[%s209_s0] sm:$0x1]   ;;  %s137_s24 = smov 88   ;;  %s138_s25 = smov 80  }
   0x4   :  { %4 = vst.msk [vmem:[#allocation0] sm:$0x1] %vm3_vm0, %v2_v6   ;;  %v109_v7 = vld [vmem:[%s209_s0 + $0x9] sm:$0x1]   ;;  %v110_v8 = vld [vmem:[%s209_s0 + $0x8] sm:$0x1]  }
   0x5   :  { %s139_s30 = smov 72   ;;  %s140_s2 = smov 64   ;;  %v111_v9 = vld [vmem:[%s209_s0 + $0x7] sm:$0x1]   ;;  %v112_v10 = vld [vmem:[%s209_s0 + $0x6] sm:$0x1]  }
   0x6   :  { %13 = vrot.lane.b32.xlu0 %v104_v2, %s135_s16  ;;  %25 = vrot.lane.b32.xlu1 %v106_v3, %s136_s17  ;;  %s141_s7 = smov 56   ;;  %s142_s8 = smov 48   ;;  %v113_v11 = vld [vmem:[%s209_s0 + $0x5] sm:$0x1]   ;;  %v114_v12 = vld [vmem:[%s209_s0 + $0x4] sm:$0x1]  }
   0x7   :  { %s143_s13 = smov 40   ;;  %s144_s14 = smov 32   ;;  %v115_v13 = vld [vmem:[%s209_s0 + $0x3] sm:$0x1]   ;;  %v116_v14 = vld [vmem:[%s209_s0 + $0x2] sm:$0x1]  }
   0x8   :  { %s145_s19 = smov 24   ;;  %s146_s20 = smov 16   ;;  %v117_v15 = vld [vmem:[%s209_s0 + $0x1] sm:$0x1]   ;;  %vm27_vm4 = vcmask 851712   ;;  %vm33_vm5 = vcmask 786112  }
   0x9   :  { %s147_s0 = smov 8   ;;  %vm39_vm6 = vcmask 720512   ;;  %vm45_vm7 = vcmask 654912   ;;  %vm51_vm8 = vcmask 589312   ;;  %vm57_vm9 = vcmask 523712  }
   0xa   :  { %31 = vrot.lane.b32.xlu0 %v107_v4, %s137_s24  ;;  %37 = vrot.lane.b32.xlu1 %v108_v5, %s138_s25  ;;  %vm63_vm10 = vcmask 458112   ;;  %vm69_vm11 = vcmask 392512   ;;  %vm75_vm12 = vcmask 326912   ;;  %vm81_vm13 = vcmask 261312  }
   0xb   :  { %vm87_vm14 = vcmask 195712   ;;  %vm93_vm15 = vcmask 130112  }
   0xe   :  { %43 = vrot.lane.b32.xlu0 %v109_v7, %s139_s30  ;;  %49 = vrot.lane.b32.xlu1 %v110_v8, %s140_s2 }
  0x12   :  { %55 = vrot.lane.b32.xlu0 %v111_v9, %s141_s7  ;;  %61 = vrot.lane.b32.xlu1 %v112_v10, %s142_s8 }
  0x16   :  { %67 = vrot.lane.b32.xlu0 %v113_v11, %s143_s13  ;;  %73 = vrot.lane.b32.xlu1 %v114_v12, %s144_s14 }
  0x1a   :  { %79 = vrot.lane.b32.xlu0 %v115_v13, %s145_s19  ;;  %85 = vrot.lane.b32.xlu1 %v116_v14, %s146_s20 }
  0x1e   :  { %91 = vrot.lane.b32.xlu0 %v117_v15, %s147_s0 }
  0x74   :  { %v8_v16 = vpop.permute.xlu0 %7   ;;  %v20_v17 = vpop.permute.xlu1 %19  }
  0x75   :  { %10 = vst.msk [vmem:[#allocation0] sm:$0x1] %vm9_vm1, %v8_v16  }
  0x78   :  { %v14_v18 = vpop.permute.xlu0 %13   ;;  %v26_v19 = vpop.permute.xlu1 %25  }
  0x79   :  { %16 = vst.msk [vmem:[#allocation0] sm:$0x1] %vm15_vm2, %v14_v18  }
  0x7a   :  { %22 = vst.msk [vmem:[#allocation0] sm:$0x1] %vm21_vm3, %v20_v17  }
  0x7b   :  { %28 = vst.msk [vmem:[#allocation0] sm:$0x1] %vm27_vm4, %v26_v19  }
  0x7c   :  { %v32_v20 = vpop.permute.xlu0 %31   ;;  %v38_v21 = vpop.permute.xlu1 %37  }
  0x7d   :  { %34 = vst.msk [vmem:[#allocation0] sm:$0x1] %vm33_vm5, %v32_v20  }
  0x7e   :  { %40 = vst.msk [vmem:[#allocation0] sm:$0x1] %vm39_vm6, %v38_v21  }
  0x80   :  { %v44_v22 = vpop.permute.xlu0 %43   ;;  %v50_v23 = vpop.permute.xlu1 %49  }
  0x81   :  { %46 = vst.msk [vmem:[#allocation0] sm:$0x1] %vm45_vm7, %v44_v22  }
  0x82   :  { %52 = vst.msk [vmem:[#allocation0] sm:$0x1] %vm51_vm8, %v50_v23  }
  0x84   :  { %v56_v24 = vpop.permute.xlu0 %55   ;;  %v62_v25 = vpop.permute.xlu1 %61  }
  0x85   :  { %58 = vst.msk [vmem:[#allocation0] sm:$0x1] %vm57_vm9, %v56_v24  }
  0x86   :  { %64 = vst.msk [vmem:[#allocation0] sm:$0x1] %vm63_vm10, %v62_v25  }
  0x88   :  { %v68_v26 = vpop.permute.xlu0 %67   ;;  %v74_v27 = vpop.permute.xlu1 %73  }
  0x89   :  { %70 = vst.msk [vmem:[#allocation0] sm:$0x1] %vm69_vm11, %v68_v26  }
  0x8a   :  { %76 = vst.msk [vmem:[#allocation0] sm:$0x1] %vm75_vm12, %v74_v27  }
  0x8c   :  { %v80_v28 = vpop.permute.xlu0 %79   ;;  %v86_v29 = vpop.permute.xlu1 %85  }
  0x8d   :  { %82 = vst.msk [vmem:[#allocation0] sm:$0x1] %vm81_vm13, %v80_v28  }
  0x8e   :  { %88 = vst.msk [vmem:[#allocation0] sm:$0x1] %vm87_vm14, %v86_v29  }
  0x90   :  { %v92_v30 = vpop.permute.xlu0 %91  }
  0x91   :  { %94 = vst.msk [vmem:[#allocation0] sm:$0x1] %vm93_vm15, %v92_v30  }
  0x98   :  { %v99_v31 = vld [vmem:[#allocation0] sm:$0x1] }
  0x99   :  { %102 = vst [vmem:[%s210_s1] sm:$0x1] %v99_v31 }

// kernel: conv3gn_forward.1
= control target key start
LH: loop header
LB: loop body
LE: loop exit
PB: predicated region body
PF: predicated region fallthrough
CT: control target
= control target key end

     0   :  { %v360_v0 = vmov 0.0   ;;  %vm91_vm0 = vcmask 392192   ;;  %s632_s1 = inlined_call_operand.vmem [shape: f32[432,128], index: 1, kind: input, shape index: {}]   ;;  %s633_s0 = inlined_call_operand.vmem [shape: f32[32,432], index: 0, kind: input, shape index: {}]   ;;  %s634_s2 = inlined_call_operand.vmem [shape: f32[1,128], index: 2, kind: input, shape index: {}]   ;;  %s635_s3 = inlined_call_operand.vmem [shape: f32[32,128], index: 3, kind: output, shape index: {}]  }
   0x1   :  { %189 = vmatprep.subr.mxu1 %v360_v0  ;;  %v77_v1 = vld [vmem:[%s632_s1 + $0x178] sm:$0xff]  ;;  %v76_v2 = vld [vmem:[%s632_s1 + $0x170] sm:$0xff]  ;;  %v75_v6 = vld [vmem:[%s632_s1 + $0x168] sm:$0xff] }
   0x2   :  { %v61_v3 = vld [vmem:[%s632_s1 + $0xf8] sm:$0xff]  ;;  %190 = vmatpush1.msra.mxu1 %v77_v1  ;;  %v60_v5 = vld [vmem:[%s632_s1 + $0xf0] sm:$0xff]  ;;  %v59_v8 = vld [vmem:[%s632_s1 + $0xe8] sm:$0xff] }
   0x3   :  { %307 = vmatprep.subr.mxu0 %v61_v3  ;;  %v45_v4 = vld [vmem:[%s632_s1 + $0x78] sm:$0xff]  ;;  %191 = vmatprep.subr.mxu1 %v360_v0  ;;  %v44_v7 = vld [vmem:[%s632_s1 + $0x70] sm:$0xff]  ;;  %v43_v9 = vld [vmem:[%s632_s1 + $0x68] sm:$0xff] }
   0x4   :  { %308 = vmatpush3.msra.mxu0 %v45_v4  ;;  %192 = vmatpush1.msra.mxu1 %v76_v2  ;;  %v74_v10 = vld [vmem:[%s632_s1 + $0x160] sm:$0xff]  ;;  %v73_v13 = vld [vmem:[%s632_s1 + $0x158] sm:$0xff]  ;;  %v72_v16 = vld [vmem:[%s632_s1 + $0x150] sm:$0xff] }
   0x5   :  { %309 = vmatprep.subr.mxu0 %v60_v5  ;;  %193 = vmatprep.subr.mxu1 %v360_v0  ;;  %v58_v11 = vld [vmem:[%s632_s1 + $0xe0] sm:$0xff]  ;;  %v57_v14 = vld [vmem:[%s632_s1 + $0xd8] sm:$0xff]  ;;  %v56_v17 = vld [vmem:[%s632_s1 + $0xd0] sm:$0xff] }
   0x6   :  { %310 = vmatpush3.msra.mxu0 %v44_v7  ;;  %194 = vmatpush1.msra.mxu1 %v75_v6  ;;  %v42_v12 = vld [vmem:[%s632_s1 + $0x60] sm:$0xff]  ;;  %v41_v15 = vld [vmem:[%s632_s1 + $0x58] sm:$0xff]  ;;  %v40_v18 = vld [vmem:[%s632_s1 + $0x50] sm:$0xff] }
   0x7   :  { %311 = vmatprep.subr.mxu0 %v59_v8  ;;  %195 = vmatprep.subr.mxu1 %v360_v0  ;;  %v71_v19 = vld [vmem:[%s632_s1 + $0x148] sm:$0xff]  ;;  %v70_v22 = vld [vmem:[%s632_s1 + $0x140] sm:$0xff]  ;;  %v69_v25 = vld [vmem:[%s632_s1 + $0x138] sm:$0xff] }
   0x8   :  { %312 = vmatpush3.msra.mxu0 %v43_v9  ;;  %196 = vmatpush1.msra.mxu1 %v74_v10  ;;  %v55_v20 = vld [vmem:[%s632_s1 + $0xc8] sm:$0xff]  ;;  %v54_v23 = vld [vmem:[%s632_s1 + $0xc0] sm:$0xff]  ;;  %v53_v26 = vld [vmem:[%s632_s1 + $0xb8] sm:$0xff] }
   0x9   :  { %313 = vmatprep.subr.mxu0 %v58_v11  ;;  %197 = vmatprep.subr.mxu1 %v360_v0  ;;  %v39_v21 = vld [vmem:[%s632_s1 + $0x48] sm:$0xff]  ;;  %v38_v24 = vld [vmem:[%s632_s1 + $0x40] sm:$0xff]  ;;  %v37_v27 = vld [vmem:[%s632_s1 + $0x38] sm:$0xff] }
   0xa   :  { %314 = vmatpush3.msra.mxu0 %v42_v12  ;;  %198 = vmatpush1.msra.mxu1 %v73_v13  ;;  %v68_v28 = vld [vmem:[%s632_s1 + $0x130] sm:$0xff]  ;;  %v67_v31 = vld [vmem:[%s632_s1 + $0x128] sm:$0xff]  ;;  %v66_v34 = vld [vmem:[%s632_s1 + $0x120] sm:$0xff] }
   0xb   :  { %315 = vmatprep.subr.mxu0 %v57_v14  ;;  %199 = vmatprep.subr.mxu1 %v360_v0  ;;  %v52_v29 = vld [vmem:[%s632_s1 + $0xb0] sm:$0xff]  ;;  %v51_v32 = vld [vmem:[%s632_s1 + $0xa8] sm:$0xff]  ;;  %v50_v35 = vld [vmem:[%s632_s1 + $0xa0] sm:$0xff] }
   0xc   :  { %316 = vmatpush3.msra.mxu0 %v41_v15  ;;  %200 = vmatpush1.msra.mxu1 %v72_v16  ;;  %v36_v30 = vld [vmem:[%s632_s1 + $0x30] sm:$0xff]  ;;  %v35_v33 = vld [vmem:[%s632_s1 + $0x28] sm:$0xff]  ;;  %v34_v36 = vld [vmem:[%s632_s1 + $0x20] sm:$0xff] }
   0xd   :  { %317 = vmatprep.subr.mxu0 %v56_v17  ;;  %201 = vmatprep.subr.mxu1 %v360_v0  ;;  %v65_v37 = vld [vmem:[%s632_s1 + $0x118] sm:$0xff]  ;;  %v64_v40 = vld [vmem:[%s632_s1 + $0x110] sm:$0xff]  ;;  %v63_v43 = vld [vmem:[%s632_s1 + $0x108] sm:$0xff] }
   0xe   :  { %318 = vmatpush3.msra.mxu0 %v40_v18  ;;  %202 = vmatpush1.msra.mxu1 %v71_v19  ;;  %v49_v38 = vld [vmem:[%s632_s1 + $0x98] sm:$0xff]  ;;  %v48_v41 = vld [vmem:[%s632_s1 + $0x90] sm:$0xff]  ;;  %v47_v44 = vld [vmem:[%s632_s1 + $0x88] sm:$0xff] }
   0xf   :  { %319 = vmatprep.subr.mxu0 %v55_v20  ;;  %203 = vmatprep.subr.mxu1 %v360_v0  ;;  %v33_v39 = vld [vmem:[%s632_s1 + $0x18] sm:$0xff]  ;;  %v32_v42 = vld [vmem:[%s632_s1 + $0x10] sm:$0xff]  ;;  %v31_v45 = vld [vmem:[%s632_s1 + $0x8] sm:$0xff] }
  0x10   :  { %320 = vmatpush3.msra.mxu0 %v39_v21  ;;  %204 = vmatpush1.msra.mxu1 %v70_v22  ;;  %v62_v46 = vld [vmem:[%s632_s1 + $0x100] sm:$0xff]  ;;  %v83_v49 = vld [vmem:[%s632_s1 + $0x1a8] sm:$0xff]  ;;  %v17_v54 = vld [vmem:[%s633_s0 + $0x18] sm:$0xff] }
  0x11   :  { %321 = vmatprep.subr.mxu0 %v54_v23  ;;  %205 = vmatprep.subr.mxu1 %v360_v0  ;;  %v46_v47 = vld [vmem:[%s632_s1 + $0x80] sm:$0xff]  ;;  %v15_v50 = vld [vmem:[%s633_s0 + $0x8] sm:$0xff]  ;;  %v81_v55 = vld [vmem:[%s632_s1 + $0x198] sm:$0xff] }
  0x12   :  { %322 = vmatpush3.msra.mxu0 %v38_v24  ;;  %206 = vmatpush1.msra.mxu1 %v69_v25  ;;  %v30_v48 = vld [vmem:[%s632_s1] sm:$0xff]  ;;  %v19_v53 = vld [vmem:[%s633_s0 + $0x28] sm:$0xff]  ;;  %v80_v57 = vld [vmem:[%s632_s1 + $0x190] sm:$0xff] }
  0x13   :  { %323 = vmatprep.subr.mxu0 %v53_v26  ;;  %207 = vmatprep.subr.mxu1 %v360_v0  ;;  %v14_v51 = vld [vmem:[%s633_s0] sm:$0xff]  ;;  %v23_v58 = vld [vmem:[%s633_s0 + $0x48] sm:$0xff]  ;;  %v16_v63 = vld [vmem:[%s633_s0 + $0x10] sm:$0xff] }
  0x14   :  { %324 = vmatpush3.msra.mxu0 %v37_v27  ;;  %208 = vmatpush1.msra.mxu1 %v68_v28  ;;  %v82_v52 = vld [vmem:[%s632_s1 + $0x1a0] sm:$0xff]  ;;  %v79_v59 = vld [vmem:[%s632_s1 + $0x188] sm:$0xff]  ;;  %v21_v1 = vld [vmem:[%s633_s0 + $0x38] sm:$0xff] }
  0x15   :  { %325 = vmatprep.subr.mxu0 %v52_v29  ;;  %209 = vmatprep.subr.mxu1 %v360_v0  ;;  %v18_v56 = vld [vmem:[%s633_s0 + $0x20] sm:$0xff]  ;;  %v27_v62 = vld [vmem:[%s633_s0 + $0x68] sm:$0xff]  ;;  %v20_v3 = vld [vmem:[%s633_s0 + $0x30] sm:$0xff] }
  0x16   :  { %326 = vmatpush3.msra.mxu0 %v36_v30  ;;  %210 = vmatpush1.msra.mxu1 %v67_v31  ;;  %v22_v60 = vld [vmem:[%s633_s0 + $0x40] sm:$0xff]  ;;  %v24_v4 = vld [vmem:[%s633_s0 + $0x50] sm:$0xff]  ;;  %v29_v5 = vld [vmem:[%s633_s0 + $0x78] sm:$0xff] }
  0x17   :  { %327 = vmatprep.subr.mxu0 %v51_v32  ;;  %211 = vmatprep.subr.mxu1 %v360_v0  ;;  %v78_v61 = vld [vmem:[%s632_s1 + $0x180] sm:$0xff]  ;;  %v28_v6 = vld [vmem:[%s633_s0 + $0x70] sm:$0xff] }
  0x18   :  { %328 = vmatpush3.msra.mxu0 %v35_v33  ;;  %212 = vmatpush1.msra.mxu1 %v66_v34  ;;  %v26_v2 = vld [vmem:[%s633_s0 + $0x60] sm:$0xff] }
  0x19   :  { %329 = vmatprep.subr.mxu0 %v50_v35  ;;  %213 = vmatprep.subr.mxu1 %v360_v0  ;;  %v302_v12 = vld [vmem:[%s634_s2] ss:$0 sm:$0xff] }
  0x1a   :  { %330 = vmatpush3.msra.mxu0 %v34_v36  ;;  %214 = vmatpush1.msra.mxu1 %v65_v37 }
  0x1b   :  { %331 = vmatprep.subr.mxu0 %v49_v38  ;;  %215 = vmatprep.subr.mxu1 %v360_v0 }
  0x1c   :  { %332 = vmatpush3.msra.mxu0 %v33_v39  ;;  %216 = vmatpush1.msra.mxu1 %v64_v40 }
  0x1d   :  { %333 = vmatprep.subr.mxu0 %v48_v41  ;;  %217 = vmatprep.subr.mxu1 %v360_v0 }
  0x1e   :  { %334 = vmatpush3.msra.mxu0 %v32_v42  ;;  %218 = vmatpush1.msra.mxu1 %v63_v43 }
  0x1f   :  { %335 = vmatprep.subr.mxu0 %v47_v44  ;;  %219 = vmatprep.subr.mxu1 %v360_v0 }
  0x20   :  { %336 = vmatpush3.msra.mxu0 %v31_v45  ;;  %220 = vmatpush1.msra.mxu1 %v62_v46 }
  0x21   :  { %337 = vmatprep.subr.mxu0 %v46_v47  ;;  %241 = vmatprep.subr.mxu1 %v360_v0 }
  0x22   :  { %338 = vmatpush3.msra.mxu0 %v30_v48  ;;  %242 = vmatpush2.msra.mxu1 %v83_v49 }
  0x23   :  { %168 = vmatprep.mubr.f32.mxu0 %v15_v50  ;;  %243 = vmatprep.subr.mxu1 %v360_v0 }
  0x24   :  { %169 = vmatmul.mubr.f32.vlgmr.msra.gmra.mxu0 %v14_v51  ;;  %244 = vmatpush2.msra.mxu1 %v82_v52 }
  0x25   :  { %173 = vmatprep.mubr.f32.mxu0 %v19_v53  ;;  %245 = vmatprep.subr.mxu1 %v360_v0 }
  0x26   :  { %303 = vmatprep.mubr.msk.f32.mxu1 %vm91_vm0, %v17_v54  ;;  %246 = vmatpush2.msra.mxu1 %v81_v55 }
  0x27   :  { %247 = vmatprep.subr.mxu1 %v360_v0 }
  0x28   :  { %174 = vmatmul.mubr.f32.gmra.mxu0 %v18_v56  ;;  %248 = vmatpush2.msra.mxu1 %v80_v57 }
  0x29   :  { %178 = vmatprep.mubr.f32.mxu0 %v23_v58  ;;  %249 = vmatprep.subr.mxu1 %v360_v0 }
  0x2a   :  { %250 = vmatpush2.msra.mxu1 %v79_v59 }
  0x2b   :  { %251 = vmatprep.subr.mxu1 %v360_v0  ;;  %v25_v0 = vld [vmem:[%s633_s0 + $0x58] sm:$0xff] }
  0x2c   :  { %179 = vmatmul.mubr.f32.gmra.mxu0 %v22_v60  ;;  %252 = vmatpush2.msra.mxu1 %v78_v61 }
  0x2d   :  { %183 = vmatprep.mubr.f32.mxu0 %v27_v62  ;;  %254 = vmatmul.mubr.f32.vlgmr.msra.gmra.mxu1 %v16_v63 }
  0x2e   :  { %304 = vmatprep.mubr.msk.f32.mxu1 %vm91_vm0, %v21_v1 }
  0x30   :  { %184 = vmatmul.mubr.f32.gmra.mxu0 %v26_v2 }
  0x31   :  { %259 = vmatmul.mubr.f32.gmra.mxu1 %v20_v3 }
  0x32   :  { %305 = vmatprep.mubr.msk.f32.mxu1 %vm91_vm0, %v25_v0 }
  0x35   :  { %264 = vmatmul.mubr.f32.gmra.mxu1 %v24_v4 }
  0x36   :  { %306 = vmatprep.mubr.msk.f32.mxu1 %vm91_vm0, %v29_v5 }
  0x39   :  { %269 = vmatmul.mubr.f32.gmra.mxu1 %v28_v6 }
  0xe4   :  { %v339_v7 = vpop.f32.mrf.mxu0 }
  0xe6   :  { %v340_v8 = vpop.f32.mrf.mxu0 }
  0xe7   :  { %v341_v10 = vadd.f32 %v340_v8, %v339_v7 }
  0xe8   :  { %v342_v9 = vpop.f32.mrf.mxu0 }
  0xe9   :  { %v171_v15 = vadd.f32 %v341_v10, %v302_v12 }
  0xea   :  { %v343_v11 = vpop.f32.mrf.mxu0 }
  0xeb   :  { %v344_v14 = vadd.f32 %v343_v11, %v342_v9 }
  0xec   :  { %v345_v13 = vpop.f32.mrf.mxu0 }
  0xed   :  { %v255_v16 = vpop.f32.mrf.mxu1  ;;  %v176_v23 = vadd.f32 %v344_v14, %v302_v12 }
  0xee   :  { %v346_v17 = vpop.f32.mrf.mxu0  ;;  %v256_v18 = vadd.f32 %v255_v16, %v171_v15 }
  0xef   :  { %v257_v19 = vpop.f32.mrf.mxu1  ;;  %v347_v22 = vadd.f32 %v346_v17, %v345_v13 }
  0xf0   :  { %v348_v20 = vpop.f32.mrf.mxu0  ;;  %v278_v21 = vmul.f32 0.70710677, %v256_v18  ;;  %v274_v41 = vmul.f32 0.5, %v256_v18 }
  0xf1   :  { %v260_v24 = vpop.f32.mrf.mxu1  ;;  %v181_v30 = vadd.f32 %v347_v22, %v302_v12 }
  0xf2   :  { %v349_v25 = vpop.f32.mrf.mxu0  ;;  %352 = verf.f32 %v278_v21  ;;  %v261_v26 = vadd.f32 %v260_v24, %v176_v23 }
  0xf3   :  { %v262_v27 = vpop.f32.mrf.mxu1  ;;  %v350_v29 = vadd.f32 %v349_v25, %v348_v20 }
  0xf4   :  { %v279_v28 = vmul.f32 0.70710677, %v261_v26  ;;  %v275_v45 = vmul.f32 0.5, %v261_v26 }
  0xf5   :  { %v265_v31 = vpop.f32.mrf.mxu1  ;;  %v186_v35 = vadd.f32 %v350_v29, %v302_v12 }
  0xf6   :  { %354 = verf.f32 %v279_v28  ;;  %v266_v32 = vadd.f32 %v265_v31, %v181_v30 }
  0xf7   :  { %v267_v33 = vpop.f32.mrf.mxu1 }
  0xf8   :  { %v280_v34 = vmul.f32 0.70710677, %v266_v32  ;;  %v276_v49 = vmul.f32 0.5, %v266_v32 }
  0xf9   :  { %v270_v36 = vpop.f32.mrf.mxu1 }
  0xfa   :  { %356 = verf.f32 %v280_v34  ;;  %v271_v37 = vadd.f32 %v270_v36, %v186_v35 }
  0xfb   :  { %v272_v38 = vpop.f32.mrf.mxu1 }
  0xfc   :  { %v281_v39 = vmul.f32 0.70710677, %v271_v37  ;;  %v277_v53 = vmul.f32 0.5, %v271_v37 }
  0xfe   :  { %358 = verf.f32 %v281_v39 }
  0xff   :  { %v353_v40 = vpop.eup %352 }
 0x100   :  { %v286_v42 = vadd.f32 1.0, %v353_v40 }
 0x102   :  { %v290_v43 = vmul.f32 %v286_v42, %v274_v41 }
 0x103   :  { %v355_v44 = vpop.eup %354 }
 0x104   :  { %294 = vst [vmem:[%s635_s3] sm:$0xff] %v290_v43  ;;  %v287_v46 = vadd.f32 1.0, %v355_v44 }
 0x106   :  { %v291_v47 = vmul.f32 %v287_v46, %v275_v45 }
 0x107   :  { %v357_v48 = vpop.eup %356 }
 0x108   :  { %295 = vst [vmem:[%s635_s3 + $0x8] sm:$0xff] %v291_v47  ;;  %v288_v50 = vadd.f32 1.0, %v357_v48 }
 0x10a   :  { %v292_v51 = vmul.f32 %v288_v50, %v276_v49 }
 0x10b   :  { %v359_v52 = vpop.eup %358 }
 0x10c   :  { %296 = vst [vmem:[%s635_s3 + $0x10] sm:$0xff] %v292_v51  ;;  %v289_v54 = vadd.f32 1.0, %v359_v52 }
 0x10e   :  { %v293_v55 = vmul.f32 %v289_v54, %v277_v53 }
 0x110   :  { %297 = vst [vmem:[%s635_s3 + $0x18] sm:$0xff] %v293_v55 }

// kernel: tile.8
= control target key start
LH: loop header
LB: loop body
LE: loop exit
PB: predicated region body
PF: predicated region fallthrough
CT: control target
= control target key end

     0   :  { %s28_s0 = inlined_call_operand.vmem [shape: f32[8], index: 0, kind: input, shape index: {}]   ;;  %s29_s1 = inlined_call_operand.vmem [shape: f32[16,8], index: 1, kind: output, shape index: {}]  }
   0x1   :  { %v4_v0 = vld [vmem:[%s28_s0] ss:$0 sm:$0xff] }
   0x2   :  { %5 = vst [vmem:[%s29_s1] sm:$0xff] %v4_v0  ;;  %8 = vst [vmem:[%s29_s1 + $0x8] sm:$0xff] %v4_v0 }

// kernel: tile.9
= control target key start
LH: loop header
LB: loop body
LE: loop exit
PB: predicated region body
PF: predicated region fallthrough
CT: control target
= control target key end

     0   :  { %s133_s10 = smov 120   ;;  %s134_s11 = smov 104   ;;  %vm3_vm0 = vcmask 64512   ;;  %vm9_vm1 = vcmask 1048512   ;;  %vm15_vm2 = vcmask 982912   ;;  %vm21_vm3 = vcmask 917312   ;;  %s209_s0 = inlined_call_operand.vmem [shape: f32[16,8], index: 0, kind: input, shape index: {}]   ;;  %s210_s1 = inlined_call_operand.vmem [shape: f32[1,128], index: 1, kind: output, shape index: {}]  }
   0x1   :  { %v103_v0 = vld [vmem:[%s209_s0 + $0xf] sm:$0x1]   ;;  %v105_v1 = vld [vmem:[%s209_s0 + $0xd] sm:$0x1]   ;;  %v104_v2 = vld [vmem:[%s209_s0 + $0xe] sm:$0x1]  }
   0x2   :  { %7 = vrot.lane.b32.xlu0 %v103_v0, %s133_s10  ;;  %19 = vrot.lane.b32.xlu1 %v105_v1, %s134_s11  ;;  %v106_v3 = vld [vmem:[%s209_s0 + $0xc] sm:$0x1]   ;;  %s135_s16 = smov 112   ;;  %s136_s17 = smov 96   ;;  %v107_v4 = vld [vmem:[%s209_s0 + $0xb] sm:$0x1]  }
   0x3   :  { %v108_v5 = vld [vmem:[%s209_s0 + $0xa] sm:$0x1]   ;;  %v2_v6 = vld [vmem:[%s209_s0] sm:$0x1]   ;;  %s137_s24 = smov 88   ;;  %s138_s25 = smov 80  }
   0x4   :  { %4 = vst.msk [vmem:[#allocation0] sm:$0x1] %vm3_vm0, %v2_v6   ;;  %v109_v7 = vld [vmem:[%s209_s0 + $0x9] sm:$0x1]   ;;  %v110_v8 = vld [vmem:[%s209_s0 + $0x8] sm:$0x1]  }
   0x5   :  { %s139_s30 = smov 72   ;;  %s140_s2 = smov 64   ;;  %v111_v9 = vld [vmem:[%s209_s0 + $0x7] sm:$0x1]   ;;  %v112_v10 = vld [vmem:[%s209_s0 + $0x6] sm:$0x1]  }
   0x6   :  { %13 = vrot.lane.b32.xlu0 %v104_v2, %s135_s16  ;;  %25 = vrot.lane.b32.xlu1 %v106_v3, %s136_s17  ;;  %s141_s7 = smov 56   ;;  %s142_s8 = smov 48   ;;  %v113_v11 = vld [vmem:[%s209_s0 + $0x5] sm:$0x1]   ;;  %v114_v12 = vld [vmem:[%s209_s0 + $0x4] sm:$0x1]  }
   0x7   :  { %s143_s13 = smov 40   ;;  %s144_s14 = smov 32   ;;  %v115_v13 = vld [vmem:[%s209_s0 + $0x3] sm:$0x1]   ;;  %v116_v14 = vld [vmem:[%s209_s0 + $0x2] sm:$0x1]  }
   0x8   :  { %s145_s19 = smov 24   ;;  %s146_s20 = smov 16   ;;  %v117_v15 = vld [vmem:[%s209_s0 + $0x1] sm:$0x1]   ;;  %vm27_vm4 = vcmask 851712   ;;  %vm33_vm5 = vcmask 786112  }
   0x9   :  { %s147_s0 = smov 8   ;;  %vm39_vm6 = vcmask 720512   ;;  %vm45_vm7 = vcmask 654912   ;;  %vm51_vm8 = vcmask 589312   ;;  %vm57_vm9 = vcmask 523712  }
   0xa   :  { %31 = vrot.lane.b32.xlu0 %v107_v4, %s137_s24  ;;  %37 = vrot.lane.b32.xlu1 %v108_v5, %s138_s25  ;;  %vm63_vm10 = vcmask 458112   ;;  %vm69_vm11 = vcmask 392512   ;;  %vm75_vm12 = vcmask 326912   ;;  %vm81_vm13 = vcmask 261312  }
   0xb   :  { %vm87_vm14 = vcmask 195712   ;;  %vm93_vm15 = vcmask 130112  }
   0xe   :  { %43 = vrot.lane.b32.xlu0 %v109_v7, %s139_s30  ;;  %49 = vrot.lane.b32.xlu1 %v110_v8, %s140_s2 }
  0x12   :  { %55 = vrot.lane.b32.xlu0 %v111_v9, %s141_s7  ;;  %61 = vrot.lane.b32.xlu1 %v112_v10, %s142_s8 }
  0x16   :  { %67 = vrot.lane.b32.xlu0 %v113_v11, %s143_s13  ;;  %73 = vrot.lane.b32.xlu1 %v114_v12, %s144_s14 }
  0x1a   :  { %79 = vrot.lane.b32.xlu0 %v115_v13, %s145_s19  ;;  %85 = vrot.lane.b32.xlu1 %v116_v14, %s146_s20 }
  0x1e   :  { %91 = vrot.lane.b32.xlu0 %v117_v15, %s147_s0 }
  0x74   :  { %v8_v16 = vpop.permute.xlu0 %7   ;;  %v20_v17 = vpop.permute.xlu1 %19  }
  0x75   :  { %10 = vst.msk [vmem:[#allocation0] sm:$0x1] %vm9_vm1, %v8_v16  }
  0x78   :  { %v14_v18 = vpop.permute.xlu0 %13   ;;  %v26_v19 = vpop.permute.xlu1 %25  }
  0x79   :  { %16 = vst.msk [vmem:[#allocation0] sm:$0x1] %vm15_vm2, %v14_v18  }
  0x7a   :  { %22 = vst.msk [vmem:[#allocation0] sm:$0x1] %vm21_vm3, %v20_v17  }
  0x7b   :  { %28 = vst.msk [vmem:[#allocation0] sm:$0x1] %vm27_vm4, %v26_v19  }
  0x7c   :  { %v32_v20 = vpop.permute.xlu0 %31   ;;  %v38_v21 = vpop.permute.xlu1 %37  }
  0x7d   :  { %34 = vst.msk [vmem:[#allocation0] sm:$0x1] %vm33_vm5, %v32_v20  }
  0x7e   :  { %40 = vst.msk [vmem:[#allocation0] sm:$0x1] %vm39_vm6, %v38_v21  }
  0x80   :  { %v44_v22 = vpop.permute.xlu0 %43   ;;  %v50_v23 = vpop.permute.xlu1 %49  }
  0x81   :  { %46 = vst.msk [vmem:[#allocation0] sm:$0x1] %vm45_vm7, %v44_v22  }
  0x82   :  { %52 = vst.msk [vmem:[#allocation0] sm:$0x1] %vm51_vm8, %v50_v23  }
  0x84   :  { %v56_v24 = vpop.permute.xlu0 %55   ;;  %v62_v25 = vpop.permute.xlu1 %61  }
  0x85   :  { %58 = vst.msk [vmem:[#allocation0] sm:$0x1] %vm57_vm9, %v56_v24  }
  0x86   :  { %64 = vst.msk [vmem:[#allocation0] sm:$0x1] %vm63_vm10, %v62_v25  }
  0x88   :  { %v68_v26 = vpop.permute.xlu0 %67   ;;  %v74_v27 = vpop.permute.xlu1 %73  }
  0x89   :  { %70 = vst.msk [vmem:[#allocation0] sm:$0x1] %vm69_vm11, %v68_v26  }
  0x8a   :  { %76 = vst.msk [vmem:[#allocation0] sm:$0x1] %vm75_vm12, %v74_v27  }
  0x8c   :  { %v80_v28 = vpop.permute.xlu0 %79   ;;  %v86_v29 = vpop.permute.xlu1 %85  }
  0x8d   :  { %82 = vst.msk [vmem:[#allocation0] sm:$0x1] %vm81_vm13, %v80_v28  }
  0x8e   :  { %88 = vst.msk [vmem:[#allocation0] sm:$0x1] %vm87_vm14, %v86_v29  }
  0x90   :  { %v92_v30 = vpop.permute.xlu0 %91  }
  0x91   :  { %94 = vst.msk [vmem:[#allocation0] sm:$0x1] %vm93_vm15, %v92_v30  }
  0x98   :  { %v99_v31 = vld [vmem:[#allocation0] sm:$0x1] }
  0x99   :  { %102 = vst [vmem:[%s210_s1] sm:$0x1] %v99_v31 }

// kernel: conv3gn_forward.1
= control target key start
LH: loop header
LB: loop body
LE: loop exit
PB: predicated region body
PF: predicated region fallthrough
CT: control target
= control target key end

     0   :  { %v360_v0 = vmov 0.0   ;;  %vm91_vm0 = vcmask 392192   ;;  %s632_s1 = inlined_call_operand.vmem [shape: f32[432,128], index: 1, kind: input, shape index: {}]   ;;  %s633_s0 = inlined_call_operand.vmem [shape: f32[32,432], index: 0, kind: input, shape index: {}]   ;;  %s634_s2 = inlined_call_operand.vmem [shape: f32[1,128], index: 2, kind: input, shape index: {}]   ;;  %s635_s3 = inlined_call_operand.vmem [shape: f32[32,128], index: 3, kind: output, shape index: {}]  }
   0x1   :  { %189 = vmatprep.subr.mxu1 %v360_v0  ;;  %v77_v1 = vld [vmem:[%s632_s1 + $0x178] sm:$0xff]  ;;  %v76_v2 = vld [vmem:[%s632_s1 + $0x170] sm:$0xff]  ;;  %v75_v6 = vld [vmem:[%s632_s1 + $0x168] sm:$0xff] }
   0x2   :  { %v61_v3 = vld [vmem:[%s632_s1 + $0xf8] sm:$0xff]  ;;  %190 = vmatpush1.msra.mxu1 %v77_v1  ;;  %v60_v5 = vld [vmem:[%s632_s1 + $0xf0] sm:$0xff]  ;;  %v59_v8 = vld [vmem:[%s632_s1 + $0xe8] sm:$0xff] }
   0x3   :  { %307 = vmatprep.subr.mxu0 %v61_v3  ;;  %v45_v4 = vld [vmem:[%s632_s1 + $0x78] sm:$0xff]  ;;  %191 = vmatprep.subr.mxu1 %v360_v0  ;;  %v44_v7 = vld [vmem:[%s632_s1 + $0x70] sm:$0xff]  ;;  %v43_v9 = vld [vmem:[%s632_s1 + $0x68] sm:$0xff] }
   0x4   :  { %308 = vmatpush3.msra.mxu0 %v45_v4  ;;  %192 = vmatpush1.msra.mxu1 %v76_v2  ;;  %v74_v10 = vld [vmem:[%s632_s1 + $0x160] sm:$0xff]  ;;  %v73_v13 = vld [vmem:[%s632_s1 + $0x158] sm:$0xff]  ;;  %v72_v16 = vld [vmem:[%s632_s1 + $0x150] sm:$0xff] }
   0x5   :  { %309 = vmatprep.subr.mxu0 %v60_v5  ;;  %193 = vmatprep.subr.mxu1 %v360_v0  ;;  %v58_v11 = vld [vmem:[%s632_s1 + $0xe0] sm:$0xff]  ;;  %v57_v14 = vld [vmem:[%s632_s1 + $0xd8] sm:$0xff]  ;;  %v56_v17 = vld [vmem:[%s632_s1 + $0xd0] sm:$0xff] }
   0x6   :  { %310 = vmatpush3.msra.mxu0 %v44_v7  ;;  %194 = vmatpush1.msra.mxu1 %v75_v6  ;;  %v42_v12 = vld [vmem:[%s632_s1 + $0x60] sm:$0xff]  ;;  %v41_v15 = vld [vmem:[%s632_s1 + $0x58] sm:$0xff]  ;;  %v40_v18 = vld [vmem:[%s632_s1 + $0x50] sm:$0xff] }
   0x7   :  { %311 = vmatprep.subr.mxu0 %v59_v8  ;;  %195 = vmatprep.subr.mxu1 %v360_v0  ;;  %v71_v19 = vld [vmem:[%s632_s1 + $0x148] sm:$0xff]  ;;  %v70_v22 = vld [vmem:[%s632_s1 + $0x140] sm:$0xff]  ;;  %v69_v25 = vld [vmem:[%s632_s1 + $0x138] sm:$0xff] }
   0x8   :  { %312 = vmatpush3.msra.mxu0 %v43_v9  ;;  %196 = vmatpush1.msra.mxu1 %v74_v10  ;;  %v55_v20 = vld [vmem:[%s632_s1 + $0xc8] sm:$0xff]  ;;  %v54_v23 = vld [vmem:[%s632_s1 + $0xc0] sm:$0xff]  ;;  %v53_v26 = vld [vmem:[%s632_s1 + $0xb8] sm:$0xff] }
   0x9   :  { %313 = vmatprep.subr.mxu0 %v58_v11  ;;  %197 = vmatprep.subr.mxu1 %v360_v0  ;;  %v39_v21 = vld [vmem:[%s632_s1 + $0x48] sm:$0xff]  ;;  %v38_v24 = vld [vmem:[%s632_s1 + $0x40] sm:$0xff]  ;;  %v37_v27 = vld [vmem:[%s632_s1 + $0x38] sm:$0xff] }
   0xa   :  { %314 = vmatpush3.msra.mxu0 %v42_v12  ;;  %198 = vmatpush1.msra.mxu1 %v73_v13  ;;  %v68_v28 = vld [vmem:[%s632_s1 + $0x130] sm:$0xff]  ;;  %v67_v31 = vld [vmem:[%s632_s1 + $0x128] sm:$0xff]  ;;  %v66_v34 = vld [vmem:[%s632_s1 + $0x120] sm:$0xff] }
   0xb   :  { %315 = vmatprep.subr.mxu0 %v57_v14  ;;  %199 = vmatprep.subr.mxu1 %v360_v0  ;;  %v52_v29 = vld [vmem:[%s632_s1 + $0xb0] sm:$0xff]  ;;  %v51_v32 = vld [vmem:[%s632_s1 + $0xa8] sm:$0xff]  ;;  %v50_v35 = vld [vmem:[%s632_s1 + $0xa0] sm:$0xff] }
   0xc   :  { %316 = vmatpush3.msra.mxu0 %v41_v15  ;;  %200 = vmatpush1.msra.mxu1 %v72_v16  ;;  %v36_v30 = vld [vmem:[%s632_s1 + $0x30] sm:$0xff]  ;;  %v35_v33 = vld [vmem:[%s632_s1 + $0x28] sm:$0xff]  ;;  %v34_v36 = vld [vmem:[%s632_s1 + $0x20] sm:$0xff] }
   0xd   :  { %317 = vmatprep.subr.mxu0 %v56_v17  ;;  %201 = vmatprep.subr.mxu1 %v360_v0  ;;  %v65_v37 = vld [vmem:[%s632_s1 + $0x118] sm:$0xff]  ;;  %v64_v40 = vld [vmem:[%s632_s1 + $0x110] sm:$0xff]  ;;  %v63_v43 = vld [vmem:[%s632_s1 + $0x108] sm:$0xff] }
   0xe   :  { %318 = vmatpush3.msra.mxu0 %v40_v18  ;;  %202 = vmatpush1.msra.mxu1 %v71_v19  ;;  %v49_v38 = vld [vmem:[%s632_s1 + $0x98] sm:$0xff]  ;;  %v48_v41 = vld [vmem:[%s632_s1 + $0x90] sm:$0xff]  ;;  %v47_v44 = vld [vmem:[%s632_s1 + $0x88] sm:$0xff] }
   0xf   :  { %319 = vmatprep.subr.mxu0 %v55_v20  ;;  %203 = vmatprep.subr.mxu1 %v360_v0  ;;  %v33_v39 = vld [vmem:[%s632_s1 + $0x18] sm:$0xff]  ;;  %v32_v42 = vld [vmem:[%s632_s1 + $0x10] sm:$0xff]  ;;  %v31_v45 = vld [vmem:[%s632_s1 + $0x8] sm:$0xff] }
  0x10   :  { %320 = vmatpush3.msra.mxu0 %v39_v21  ;;  %204 = vmatpush1.msra.mxu1 %v70_v22  ;;  %v62_v46 = vld [vmem:[%s632_s1 + $0x100] sm:$0xff]  ;;  %v83_v49 = vld [vmem:[%s632_s1 + $0x1a8] sm:$0xff]  ;;  %v17_v54 = vld [vmem:[%s633_s0 + $0x18] sm:$0xff] }
  0x11   :  { %321 = vmatprep.subr.mxu0 %v54_v23  ;;  %205 = vmatprep.subr.mxu1 %v360_v0  ;;  %v46_v47 = vld [vmem:[%s632_s1 + $0x80] sm:$0xff]  ;;  %v15_v50 = vld [vmem:[%s633_s0 + $0x8] sm:$0xff]  ;;  %v81_v55 = vld [vmem:[%s632_s1 + $0x198] sm:$0xff] }
  0x12   :  { %322 = vmatpush3.msra.mxu0 %v38_v24  ;;  %206 = vmatpush1.msra.mxu1 %v69_v25  ;;  %v30_v48 = vld [vmem:[%s632_s1] sm:$0xff]  ;;  %v19_v53 = vld [vmem:[%s633_s0 + $0x28] sm:$0xff]  ;;  %v80_v57 = vld [vmem:[%s632_s1 + $0x190] sm:$0xff] }
  0x13   :  { %323 = vmatprep.subr.mxu0 %v53_v26  ;;  %207 = vmatprep.subr.mxu1 %v360_v0  ;;  %v14_v51 = vld [vmem:[%s633_s0] sm:$0xff]  ;;  %v23_v58 = vld [vmem:[%s633_s0 + $0x48] sm:$0xff]  ;;  %v16_v63 = vld [vmem:[%s633_s0 + $0x10] sm:$0xff] }
  0x14   :  { %324 = vmatpush3.msra.mxu0 %v37_v27  ;;  %208 = vmatpush1.msra.mxu1 %v68_v28  ;;  %v82_v52 = vld [vmem:[%s632_s1 + $0x1a0] sm:$0xff]  ;;  %v79_v59 = vld [vmem:[%s632_s1 + $0x188] sm:$0xff]  ;;  %v21_v1 = vld [vmem:[%s633_s0 + $0x38] sm:$0xff] }
  0x15   :  { %325 = vmatprep.subr.mxu0 %v52_v29  ;;  %209 = vmatprep.subr.mxu1 %v360_v0  ;;  %v18_v56 = vld [vmem:[%s633_s0 + $0x20] sm:$0xff]  ;;  %v27_v62 = vld [vmem:[%s633_s0 + $0x68] sm:$0xff]  ;;  %v20_v3 = vld [vmem:[%s633_s0 + $0x30] sm:$0xff] }
  0x16   :  { %326 = vmatpush3.msra.mxu0 %v36_v30  ;;  %210 = vmatpush1.msra.mxu1 %v67_v31  ;;  %v22_v60 = vld [vmem:[%s633_s0 + $0x40] sm:$0xff]  ;;  %v24_v4 = vld [vmem:[%s633_s0 + $0x50] sm:$0xff]  ;;  %v29_v5 = vld [vmem:[%s633_s0 + $0x78] sm:$0xff] }
  0x17   :  { %327 = vmatprep.subr.mxu0 %v51_v32  ;;  %211 = vmatprep.subr.mxu1 %v360_v0  ;;  %v78_v61 = vld [vmem:[%s632_s1 + $0x180] sm:$0xff]  ;;  %v28_v6 = vld [vmem:[%s633_s0 + $0x70] sm:$0xff] }
  0x18   :  { %328 = vmatpush3.msra.mxu0 %v35_v33  ;;  %212 = vmatpush1.msra.mxu1 %v66_v34  ;;  %v26_v2 = vld [vmem:[%s633_s0 + $0x60] sm:$0xff] }
  0x19   :  { %329 = vmatprep.subr.mxu0 %v50_v35  ;;  %213 = vmatprep.subr.mxu1 %v360_v0  ;;  %v302_v12 = vld [vmem:[%s634_s2] ss:$0 sm:$0xff] }
  0x1a   :  { %330 = vmatpush3.msra.mxu0 %v34_v36  ;;  %214 = vmatpush1.msra.mxu1 %v65_v37 }
  0x1b   :  { %331 = vmatprep.subr.mxu0 %v49_v38  ;;  %215 = vmatprep.subr.mxu1 %v360_v0 }
  0x1c   :  { %332 = vmatpush3.msra.mxu0 %v33_v39  ;;  %216 = vmatpush1.msra.mxu1 %v64_v40 }
  0x1d   :  { %333 = vmatprep.subr.mxu0 %v48_v41  ;;  %217 = vmatprep.subr.mxu1 %v360_v0 }
  0x1e   :  { %334 = vmatpush3.msra.mxu0 %v32_v42  ;;  %218 = vmatpush1.msra.mxu1 %v63_v43 }
  0x1f   :  { %335 = vmatprep.subr.mxu0 %v47_v44  ;;  %219 = vmatprep.subr.mxu1 %v360_v0 }
  0x20   :  { %336 = vmatpush3.msra.mxu0 %v31_v45  ;;  %220 = vmatpush1.msra.mxu1 %v62_v46 }
  0x21   :  { %337 = vmatprep.subr.mxu0 %v46_v47  ;;  %241 = vmatprep.subr.mxu1 %v360_v0 }
  0x22   :  { %338 = vmatpush3.msra.mxu0 %v30_v48  ;;  %242 = vmatpush2.msra.mxu1 %v83_v49 }
  0x23   :  { %168 = vmatprep.mubr.f32.mxu0 %v15_v50  ;;  %243 = vmatprep.subr.mxu1 %v360_v0 }
  0x24   :  { %169 = vmatmul.mubr.f32.vlgmr.msra.gmra.mxu0 %v14_v51  ;;  %244 = vmatpush2.msra.mxu1 %v82_v52 }
  0x25   :  { %173 = vmatprep.mubr.f32.mxu0 %v19_v53  ;;  %245 = vmatprep.subr.mxu1 %v360_v0 }
  0x26   :  { %303 = vmatprep.mubr.msk.f32.mxu1 %vm91_vm0, %v17_v54  ;;  %246 = vmatpush2.msra.mxu1 %v81_v55 }
  0x27   :  { %247 = vmatprep.subr.mxu1 %v360_v0 }
  0x28   :  { %174 = vmatmul.mubr.f32.gmra.mxu0 %v18_v56  ;;  %248 = vmatpush2.msra.mxu1 %v80_v57 }
  0x29   :  { %178 = vmatprep.mubr.f32.mxu0 %v23_v58  ;;  %249 = vmatprep.subr.mxu1 %v360_v0 }
  0x2a   :  { %250 = vmatpush2.msra.mxu1 %v79_v59 }
  0x2b   :  { %251 = vmatprep.subr.mxu1 %v360_v0  ;;  %v25_v0 = vld [vmem:[%s633_s0 + $0x58] sm:$0xff] }
  0x2c   :  { %179 = vmatmul.mubr.f32.gmra.mxu0 %v22_v60  ;;  %252 = vmatpush2.msra.mxu1 %v78_v61 }
  0x2d   :  { %183 = vmatprep.mubr.f32.mxu0 %v27_v62  ;;  %254 = vmatmul.mubr.f32.vlgmr.msra.gmra.mxu1 %v16_v63 }
  0x2e   :  { %304 = vmatprep.mubr.msk.f32.mxu1 %vm91_vm0, %v21_v1 }
  0x30   :  { %184 = vmatmul.mubr.f32.gmra.mxu0 %v26_v2 }
  0x31   :  { %259 = vmatmul.mubr.f32.gmra.mxu1 %v20_v3 }
  0x32   :  { %305 = vmatprep.mubr.msk.f32.mxu1 %vm91_vm0, %v25_v0 }
  0x35   :  { %264 = vmatmul.mubr.f32.gmra.mxu1 %v24_v4 }
  0x36   :  { %306 = vmatprep.mubr.msk.f32.mxu1 %vm91_vm0, %v29_v5 }
  0x39   :  { %269 = vmatmul.mubr.f32.gmra.mxu1 %v28_v6 }
  0xe4   :  { %v339_v7 = vpop.f32.mrf.mxu0 }
  0xe6   :  { %v340_v8 = vpop.f32.mrf.mxu0 }
  0xe7   :  { %v341_v10 = vadd.f32 %v340_v8, %v339_v7 }
  0xe8   :  { %v342_v9 = vpop.f32.mrf.mxu0 }
  0xe9   :  { %v171_v15 = vadd.f32 %v341_v10, %v302_v12 }
  0xea   :  { %v343_v11 = vpop.f32.mrf.mxu0 }
  0xeb   :  { %v344_v14 = vadd.f32 %v343_v11, %v342_v9 }
  0xec   :  { %v345_v13 = vpop.f32.mrf.mxu0 }
  0xed   :  { %v255_v16 = vpop.f32.mrf.mxu1  ;;  %v176_v23 = vadd.f32 %v344_v14, %v302_v12 }
  0xee   :  { %v346_v17 = vpop.f32.mrf.mxu0  ;;  %v256_v18 = vadd.f32 %v255_v16, %v171_v15 }
  0xef   :  { %v257_v19 = vpop.f32.mrf.mxu1  ;;  %v347_v22 = vadd.f32 %v346_v17, %v345_v13 }
  0xf0   :  { %v348_v20 = vpop.f32.mrf.mxu0  ;;  %v278_v21 = vmul.f32 0.70710677, %v256_v18  ;;  %v274_v41 = vmul.f32 0.5, %v256_v18 }
  0xf1   :  { %v260_v24 = vpop.f32.mrf.mxu1  ;;  %v181_v30 = vadd.f32 %v347_v22, %v302_v12 }
  0xf2   :  { %v349_v25 = vpop.f32.mrf.mxu0  ;;  %352 = verf.f32 %v278_v21  ;;  %v261_v26 = vadd.f32 %v260_v24, %v176_v23 }
  0xf3   :  { %v262_v27 = vpop.f32.mrf.mxu1  ;;  %v350_v29 = vadd.f32 %v349_v25, %v348_v20 }
  0xf4   :  { %v279_v28 = vmul.f32 0.70710677, %v261_v26  ;;  %v275_v45 = vmul.f32 0.5, %v261_v26 }
  0xf5   :  { %v265_v31 = vpop.f32.mrf.mxu1  ;;  %v186_v35 = vadd.f32 %v350_v29, %v302_v12 }
  0xf6   :  { %354 = verf.f32 %v279_v28  ;;  %v266_v32 = vadd.f32 %v265_v31, %v181_v30 }
  0xf7   :  { %v267_v33 = vpop.f32.mrf.mxu1 }
  0xf8   :  { %v280_v34 = vmul.f32 0.70710677, %v266_v32  ;;  %v276_v49 = vmul.f32 0.5, %v266_v32 }
  0xf9   :  { %v270_v36 = vpop.f32.mrf.mxu1 }
  0xfa   :  { %356 = verf.f32 %v280_v34  ;;  %v271_v37 = vadd.f32 %v270_v36, %v186_v35 }
  0xfb   :  { %v272_v38 = vpop.f32.mrf.mxu1 }
  0xfc   :  { %v281_v39 = vmul.f32 0.70710677, %v271_v37  ;;  %v277_v53 = vmul.f32 0.5, %v271_v37 }
  0xfe   :  { %358 = verf.f32 %v281_v39 }
  0xff   :  { %v353_v40 = vpop.eup %352 }
 0x100   :  { %v286_v42 = vadd.f32 1.0, %v353_v40 }
 0x102   :  { %v290_v43 = vmul.f32 %v286_v42, %v274_v41 }
 0x103   :  { %v355_v44 = vpop.eup %354 }
 0x104   :  { %294 = vst [vmem:[%s635_s3] sm:$0xff] %v290_v43  ;;  %v287_v46 = vadd.f32 1.0, %v355_v44 }
 0x106   :  { %v291_v47 = vmul.f32 %v287_v46, %v275_v45 }
 0x107   :  { %v357_v48 = vpop.eup %356 }
 0x108   :  { %295 = vst [vmem:[%s635_s3 + $0x8] sm:$0xff] %v291_v47  ;;  %v288_v50 = vadd.f32 1.0, %v357_v48 }
 0x10a   :  { %v292_v51 = vmul.f32 %v288_v50, %v276_v49 }
 0x10b   :  { %v359_v52 = vpop.eup %358 }
 0x10c   :  { %296 = vst [vmem:[%s635_s3 + $0x10] sm:$0xff] %v292_v51  ;;  %v289_v54 = vadd.f32 1.0, %v359_v52 }
 0x10e   :  { %v293_v55 = vmul.f32 %v289_v54, %v277_v53 }
 0x110   :  { %297 = vst [vmem:[%s635_s3 + $0x18] sm:$0xff] %v293_v55 }

</bundles_post_ra>
